<compile_context>
chip_gen: v7x
topology: tpu7x:2x2x1
jax: 0.10.0
libtpu: 0.0.40
codegen_flags: <defaults>
</compile_context>

<pallas_src>
import functools

import jax
import jax.numpy as jnp
from jax.experimental import pallas as pl
from jax.experimental.pallas import tpu as pltpu


def _round_up(n, m):
    return ((n + m - 1) // m) * m


# ----------------------------- fused Pallas kernel ------------------------ #
def _decoder_fused_kernel(*refs, n_layers, dims_pad):
    """Whole decoder in one kernel body.

    refs = (x_ref, w_0 ... w_{L-1}, bias_slab_ref, o_ref), all VMEM blocks.
      x_ref : (tile_b, in_dim)                       (in_dim unpadded)
      w_0   : (in_dim, dims_pad[1])                  output dim padded to 128
      w_i>0 : (dims_pad[i], dims_pad[i+1])           both dims padded to 128
      bias  : (n_layers, max(dims_pad[1:]))          zero-padded bias slab
      o_ref : (tile_b, dims_pad[-1])
    Padded lanes carry exact zeros through every layer (zero W columns/rows +
    zero bias + ReLU(0)=0), so no masking is needed; the wrapper slices them.
    """
    x_ref = refs[0]
    w_refs = refs[1:1 + n_layers]
    b_ref = refs[1 + n_layers]
    o_ref = refs[2 + n_layers]

    bias = b_ref[...]                 # single load of the whole (tiny) bias slab
    h = x_ref[...]
    for i in range(n_layers):         # static unroll over layers (shapes known)
        y = jnp.dot(h, w_refs[i][...], preferred_element_type=jnp.float32)
        y = y + bias[i:i + 1, :dims_pad[i + 1]]
        if i < n_layers - 1:
            y = jnp.maximum(y, 0.0)   # ReLU; Dropout(0.4) == identity in eval
        h = y
    o_ref[...] = h.astype(o_ref.dtype)


@functools.partial(jax.jit, static_argnames=("out_dim",))
def _decoder_apply(x, w_pads, bias_slab, *, out_dim):
    n_layers = len(w_pads)
    in_dim = w_pads[0].shape[0]
    dims_pad = (in_dim,) + tuple(w.shape[1] for w in w_pads)

    B = x.shape[0]
    # Batch tiling: single block for small B; exactly 2 blocks in the mid range
    # (both v7x TensorCores get work via the "parallel" axis); 1024-row tiles
    # for very large B to amortize per-grid-step overhead.
    if B <= 256:
        tile_b = B                               # full-dim block: legal for any B
    elif B <= 2048:
        tile_b = _round_up((B + 1) // 2, 8)      # two row blocks
    else:
        tile_b = 1024
    B_pad = _round_up(B, tile_b)

    # Only pad the batch dim, and only when actually needed (no feature pad).
    x_in = x if B_pad == B else jnp.zeros((B_pad, in_dim), x.dtype).at[:B].set(x)

    kernel = functools.partial(
        _decoder_fused_kernel, n_layers=n_layers, dims_pad=dims_pad
    )

    # VMEM guard: resident weights+bias plus double-buffered x/out tiles, with
    # 4x headroom; floored at 16 MiB, capped at v7x's 64 MiB physical VMEM.
    elt = 4  # float32 bytes
    w_bytes = (sum(int(w.size) for w in w_pads) + int(bias_slab.size)) * elt
    io_bytes = tile_b * (in_dim + dims_pad[-1]) * elt
    vmem_limit = int(min(max(4 * 2 * (w_bytes + io_bytes), 16 << 20), 64 << 20))

    out = pl.pallas_call(
        kernel,
        out_shape=jax.ShapeDtypeStruct((B_pad, dims_pad[-1]), jnp.float32),
        grid=(B_pad // tile_b,),
        in_specs=(
            [pl.BlockSpec((tile_b, in_dim), lambda i: (i, 0))]
            + [pl.BlockSpec(w.shape, lambda i: (0, 0)) for w in w_pads]   # resident
            + [pl.BlockSpec(bias_slab.shape, lambda i: (0, 0))]           # resident
        ),
        out_specs=pl.BlockSpec((tile_b, dims_pad[-1]), lambda i: (i, 0)),
        compiler_params=pltpu.CompilerParams(
            dimension_semantics=("parallel",),    # megacore sharding on v7x
            vmem_limit_bytes=vmem_limit,
        ),
    )(x_in, *w_pads, bias_slab)

    return out[:B, :out_dim]


# --------------------------- params / packing ----------------------------- #
def init_decoder_params(key, decoder_size, n_classes, dtype=jnp.float32):
    """Deterministic init matching PyTorch nn.Linear default:
    U(-1/sqrt(fan_in), 1/sqrt(fan_in)) for both weight and bias.
    Weights are stored as (in_features, out_features)."""
    dims = list(decoder_size) + [n_classes]
    params = []
    for in_c, out_c in zip(dims[:-1], dims[1:]):
        key, kw, kb = jax.random.split(key, 3)
        bound = 1.0 / jnp.sqrt(jnp.array(in_c, dtype))
        w = jax.random.uniform(kw, (in_c, out_c), dtype, -bound, bound)
        b = jax.random.uniform(kb, (out_c,), dtype, -bound, bound)
        params.append((w, b))
    return params


def prepare_decoder_params(params):
    """One-time packing for the fused kernel.

    Weights are expected as (in_features, out_features); transpose PyTorch's
    (out, in) nn.Linear.weight when loading real checkpoints.
      * every weight is zero-padded on its OUTPUT dim to a multiple of 128
        (lane-dense matmul / store); inner layers also pad the INPUT dim to
        match the padded activations of the previous layer.  Layer 0's input
        dim is left unpadded so x needs no feature padding.
      * all biases are packed into a single (n_layers, D_max) slab (one DMA).
    """
    dims = [params[0][0].shape[0]] + [w.shape[1] for w, _ in params]
    dims_pad = [dims[0]] + [_round_up(d, 128) for d in dims[1:]]

    w_pads = []
    for (w, _), din_p, dout_p in zip(params, dims_pad[:-1], dims_pad[1:]):
        wp = jnp.zeros((din_p, dout_p), w.dtype).at[: w.shape[0], : w.shape[1]].set(w)
        w_pads.append(wp)

    d_max = max(dims_pad[1:])
    bias_slab = jnp.zeros((len(params), d_max), jnp.float32)
    for i, (_, b) in enumerate(params):
        bias_slab = bias_slab.at[i, : b.shape[0]].set(b.astype(jnp.float32))

    return tuple(w_pads), bias_slab, dims[-1]


def decoder_forward(prepared, x):
    """Eval-mode forward of the whole Decoder via one fused Pallas kernel."""
    w_pads, bias_slab, n_out = prepared
    return _decoder_apply(x, w_pads, bias_slab, out_dim=n_out)


# --------------------------------- main ----------------------------------- #
if __name__ == "__main__":
    decoder_size = (32, 64, 48)   # mirrors Decoder(decoder_size=[32,64,48], ...)
    n_classes = 10

    key = jax.random.PRNGKey(0)
    params = init_decoder_params(key, decoder_size, n_classes)
    prepared = prepare_decoder_params(params)   # one-time weight/bias packing

    def ref_forward(xx):
        h = xx
        for i, (w, b) in enumerate(params):
            h = h @ w + b
            if i < len(params) - 1:
                h = jnp.maximum(h, 0.0)
        return h

    # Small batch (single-block path) and a larger batch (2-block grid path).
    for batch in (8, 640):
        key, kx = jax.random.split(key)
        x = jax.random.normal(kx, (batch, decoder_size[0]), jnp.float32)

        out = jax.block_until_ready(decoder_forward(prepared, x))
        assert out.shape == (batch, n_classes), out.shape

        ref = ref_forward(x)
        assert jnp.allclose(out, ref, atol=1e-5, rtol=1e-5), (
            batch, float(jnp.max(jnp.abs(out - ref)))
        )

    print("KERNEL_OK")
</pallas_src>

<mosaic_0001>
module attributes {stable_mosaic.version = 11 : i64} {
  func.func @_decoder_fused_kernel(%arg0: i32, %arg1: memref<8x32xf32, #tpu.memory_space<vmem>>, %arg2: memref<32x128xf32, #tpu.memory_space<vmem>>, %arg3: memref<128x128xf32, #tpu.memory_space<vmem>>, %arg4: memref<128x128xf32, #tpu.memory_space<vmem>>, %arg5: memref<3x128xf32, #tpu.memory_space<vmem>>, %arg6: memref<8x128xf32, #tpu.memory_space<vmem>>) attributes {dimension_semantics = [#tpu.dimension_semantics<parallel>], iteration_bounds = array<i64: 1>, scalar_prefetch = 0 : i64, scratch_operands = 0 : i64, tpu.core_type = #tpu.core_type<tc>, window_params = [{transform_indices = @transform_0, window_bounds = array<i64: 8, 32>}, {pipeline_mode = #tpu.pipeline_mode<synchronous>, transform_indices = @transform_1, window_bounds = array<i64: 32, 128>}, {pipeline_mode = #tpu.pipeline_mode<synchronous>, transform_indices = @transform_2, window_bounds = array<i64: 128, 128>}, {pipeline_mode = #tpu.pipeline_mode<synchronous>, transform_indices = @transform_3, window_bounds = array<i64: 128, 128>}, {pipeline_mode = #tpu.pipeline_mode<synchronous>, transform_indices = @transform_4, window_bounds = array<i64: 3, 128>}, {transform_indices = @transform_5, window_bounds = array<i64: 8, 128>}]} {
    %c0 = arith.constant 0 : index
    %c0_0 = arith.constant 0 : index
    %0 = vector.load %arg5[%c0, %c0_0] : memref<3x128xf32, #tpu.memory_space<vmem>>, vector<3x128xf32>
    %c0_1 = arith.constant 0 : index
    %c0_2 = arith.constant 0 : index
    %1 = vector.load %arg1[%c0_1, %c0_2] : memref<8x32xf32, #tpu.memory_space<vmem>>, vector<8x32xf32>
    %c0_3 = arith.constant 0 : index
    %c0_4 = arith.constant 0 : index
    %2 = vector.load %arg2[%c0_3, %c0_4] : memref<32x128xf32, #tpu.memory_space<vmem>>, vector<32x128xf32>
    %cst = arith.constant dense<0.000000e+00> : vector<8x128xf32>
    %3 = tpu.matmul %1, %2, %cst {dimension_numbers = #tpu.dot_dimension_numbers<[1], [0], [0], [1], [0, 0, 1, 1], [], []>} : vector<8x32xf32>, vector<32x128xf32>, vector<8x128xf32> -> vector<8x128xf32>
    %4 = vector.extract_strided_slice %0 {offsets = [0, 0], sizes = [1, 128], strides = [1, 1]} : vector<3x128xf32> to vector<1x128xf32>
    %5 = vector.broadcast %4 : vector<1x128xf32> to vector<8x128xf32>
    %6 = arith.addf %3, %5 : vector<8x128xf32>
    %cst_5 = arith.constant 0.000000e+00 : f32
    %7 = vector.broadcast %cst_5 : f32 to vector<8x128xf32>
    %8 = arith.maximumf %6, %7 : vector<8x128xf32>
    %c0_6 = arith.constant 0 : index
    %c0_7 = arith.constant 0 : index
    %9 = vector.load %arg3[%c0_6, %c0_7] : memref<128x128xf32, #tpu.memory_space<vmem>>, vector<128x128xf32>
    %cst_8 = arith.constant dense<0.000000e+00> : vector<8x128xf32>
    %10 = tpu.matmul %8, %9, %cst_8 {dimension_numbers = #tpu.dot_dimension_numbers<[1], [0], [0], [1], [0, 0, 1, 1], [], []>} : vector<8x128xf32>, vector<128x128xf32>, vector<8x128xf32> -> vector<8x128xf32>
    %11 = vector.extract_strided_slice %0 {offsets = [1, 0], sizes = [1, 128], strides = [1, 1]} : vector<3x128xf32> to vector<1x128xf32>
    %12 = vector.broadcast %11 : vector<1x128xf32> to vector<8x128xf32>
    %13 = arith.addf %10, %12 : vector<8x128xf32>
    %cst_9 = arith.constant 0.000000e+00 : f32
    %14 = vector.broadcast %cst_9 : f32 to vector<8x128xf32>
    %15 = arith.maximumf %13, %14 : vector<8x128xf32>
    %c0_10 = arith.constant 0 : index
    %c0_11 = arith.constant 0 : index
    %16 = vector.load %arg4[%c0_10, %c0_11] : memref<128x128xf32, #tpu.memory_space<vmem>>, vector<128x128xf32>
    %cst_12 = arith.constant dense<0.000000e+00> : vector<8x128xf32>
    %17 = tpu.matmul %15, %16, %cst_12 {dimension_numbers = #tpu.dot_dimension_numbers<[1], [0], [0], [1], [0, 0, 1, 1], [], []>} : vector<8x128xf32>, vector<128x128xf32>, vector<8x128xf32> -> vector<8x128xf32>
    %18 = vector.extract_strided_slice %0 {offsets = [2, 0], sizes = [1, 128], strides = [1, 1]} : vector<3x128xf32> to vector<1x128xf32>
    %19 = vector.broadcast %18 : vector<1x128xf32> to vector<8x128xf32>
    %20 = arith.addf %17, %19 : vector<8x128xf32>
    %c0_13 = arith.constant 0 : index
    %c0_14 = arith.constant 0 : index
    %21 = vector.load %arg6[%c0_13, %c0_14] : memref<8x128xf32, #tpu.memory_space<vmem>>, vector<8x128xf32>
    tpu.vector_store %arg6[%c0_13, %c0_14], %20 {strides = array<i32>} : memref<8x128xf32, #tpu.memory_space<vmem>>, vector<8x128xf32>,
    return
  }
  func.func @transform_0(%arg0: i32) -> (i32, i32) {
    %c0_i32 = arith.constant 0 : i32
    %c0_i32_0 = arith.constant 0 : i32
    return %arg0, %c0_i32 : i32, i32
  }
  func.func @transform_1(%arg0: i32) -> (i32, i32) {
    %c0_i32 = arith.constant 0 : i32
    %c0_i32_0 = arith.constant 0 : i32
    %c0_i32_1 = arith.constant 0 : i32
    return %c0_i32, %c0_i32_0 : i32, i32
  }
  func.func @transform_2(%arg0: i32) -> (i32, i32) {
    %c0_i32 = arith.constant 0 : i32
    %c0_i32_0 = arith.constant 0 : i32
    %c0_i32_1 = arith.constant 0 : i32
    return %c0_i32, %c0_i32_0 : i32, i32
  }
  func.func @transform_3(%arg0: i32) -> (i32, i32) {
    %c0_i32 = arith.constant 0 : i32
    %c0_i32_0 = arith.constant 0 : i32
    %c0_i32_1 = arith.constant 0 : i32
    return %c0_i32, %c0_i32_0 : i32, i32
  }
  func.func @transform_4(%arg0: i32) -> (i32, i32) {
    %c0_i32 = arith.constant 0 : i32
    %c0_i32_0 = arith.constant 0 : i32
    %c0_i32_1 = arith.constant 0 : i32
    return %c0_i32, %c0_i32_0 : i32, i32
  }
  func.func @transform_5(%arg0: i32) -> (i32, i32) {
    %c0_i32 = arith.constant 0 : i32
    %c0_i32_0 = arith.constant 0 : i32
    return %arg0, %c0_i32 : i32, i32
  }
}

</mosaic_0001>

<bundles_post_ra>
// kernel: _decoder_apply.1
= control target key start
LH: loop header
LB: loop body
LE: loop exit
PB: predicated region body
PF: predicated region fallthrough
CT: control target
= control target key end

     0   :  { %10 = vsyncpa [#allocation3], 0  ;;  %s794_s0 = inlined_call_operand.hbm [shape: f32[8,32], index: 0, kind: input, shape index: {}]   ;;  %s795_s1 = inlined_call_operand.hbm [shape: f32[32,128], index: 1, kind: input, shape index: {}]   ;;  %s796_s2 = inlined_call_operand.hbm [shape: f32[128,128], index: 2, kind: input, shape index: {}]   ;;  %s797_s3 = inlined_call_operand.hbm [shape: f32[128,128], index: 3, kind: input, shape index: {}]   ;;  %s798_s4 = inlined_call_operand.vmem [shape: f32[3,128], index: 4, kind: input, shape index: {}]   ;;  %s799_s5 = inlined_call_operand.hbm [shape: f32[8,128], index: 5, kind: output, shape index: {}]  }
   0x1   :  { %11 = vsyncpa [#allocation6], 0 }
   0x2   :  { %12 = vsyncpa [#allocation9], 0 }
   0x3   :  { %13 = vsyncpa [#allocation4], 0  ;;  %s661_s18 = smov [#allocation5]   ;;  %s543_s22 = scalar_lea.hbm %s795_s1, 512 }
   0x4   :  { %s29_s19 = sshll.u32 %s661_s18, 4  ;;  %p544_p0 = scmp.ne.s32.totalorder %s795_s1, %s543_s22  ;;  %s30_s19 = int_to_ptr.vmem [resolvable:$true] %s29_s19 }
   0x5   :  { %p547_p1 = scmp.lt.u32.totalorder %s543_s22, %s795_s1 }
   0x7   :  { %p549_p2 = pnand %p547_p1, %p544_p0 }
   0x9   :  { %552 = shalt.err (!%p549_p2)
}
   0xa   :  { %s553_s27 = scalar_lea.vmem %s30_s19, 512  ;;  %p558_p4 = scmp.lt.s32.totalorder %s30_s19, %s30_s19 }
   0xb   :  { %p554_p3 = scmp.ne.s32.totalorder %s30_s19, %s553_s27  ;;  %p559_p5 = scmp.lt.s32.totalorder %s553_s27, %s553_s27 }
   0xd   :  { %p560_p6 = por %p559_p5, %p558_p4 }
   0xf   :  { %p561_p7 = pnand %p560_p6, %p554_p3 }
  0x11   :  { %564 = shalt.err (!%p561_p7)
}
  0x12   :  { %s662_s28 = smov 128   ;;  %s663_s29 = smov 8  }
  0x13   :  { %35 = dma.hbm_to_vmem [thread:$0]  %s795_s1, 512, %s30_s19, [#allocation6], %s662_s28, %s662_s28, %s663_s29  }
  0x14   :  { %s664_s7 = smov [#allocation2]   ;;  %s665_s9 = smov [#allocation7]  }
  0x15   :  { %s20_s8 = sshll.u32 %s664_s7, 4  ;;  %s41_s10 = sshll.u32 %s665_s9, 4  ;;  %s21_s8 = int_to_ptr.vmem [resolvable:$true] %s20_s8  ;;  %s42_s10 = int_to_ptr.vmem [resolvable:$true] %s41_s10 }
  0x16   :  { %s565_s13 = scalar_lea.hbm %s794_s0, 128 }
  0x17   :  { %p566_p8 = scmp.ne.s32.totalorder %s794_s0, %s565_s13  ;;  %p569_p9 = scmp.lt.u32.totalorder %s565_s13, %s794_s0 }
  0x19   :  { %p571_p10 = pnand %p569_p9, %p566_p8 }
  0x1b   :  { %574 = shalt.err (!%p571_p10)
}
  0x1c   :  { %s575_s1 = scalar_lea.vmem %s21_s8, 128  ;;  %p580_p12 = scmp.lt.s32.totalorder %s21_s8, %s21_s8 }
  0x1d   :  { %p576_p11 = scmp.ne.s32.totalorder %s21_s8, %s575_s1  ;;  %p581_p13 = scmp.lt.s32.totalorder %s575_s1, %s575_s1 }
  0x1f   :  { %p582_p0 = por %p581_p13, %p580_p12 }
  0x21   :  { %p583_p1 = pnand %p582_p0, %p576_p11 }
  0x23   :  { %586 = shalt.err (!%p583_p1)
}
  0x24   :  { %23 = dma.hbm_to_vmem [thread:$0]  %s794_s0, 128, %s21_s8, [#allocation3]  }
  0x25   :  { %s587_s22 = scalar_lea.hbm %s796_s2, 2048 }
  0x26   :  { %p588_p2 = scmp.ne.s32.totalorder %s796_s2, %s587_s22  ;;  %p591_p3 = scmp.lt.u32.totalorder %s587_s22, %s796_s2 }
  0x28   :  { %p593_p4 = pnand %p591_p3, %p588_p2 }
  0x2a   :  { %596 = shalt.err (!%p593_p4)
}
  0x2b   :  { %s597_s27 = scalar_lea.vmem %s42_s10, 2048  ;;  %p602_p6 = scmp.lt.s32.totalorder %s42_s10, %s42_s10 }
  0x2c   :  { %p598_p5 = scmp.ne.s32.totalorder %s42_s10, %s597_s27  ;;  %p603_p7 = scmp.lt.s32.totalorder %s597_s27, %s597_s27 }
  0x2e   :  { %p604_p8 = por %p603_p7, %p602_p6 }
  0x30   :  { %p605_p9 = pnand %p604_p8, %p598_p5 }
  0x32   :  { %608 = shalt.err (!%p605_p9)
}
  0x33   :  { %47 = dma.hbm_to_vmem [thread:$0]  %s796_s2, 2048, %s42_s10, [#allocation6], %s662_s28, %s662_s28, %s663_s29  }
  0x34   :  { %s666_s6 = smov [#allocation8]   ;;  %s609_s11 = scalar_lea.hbm %s797_s3, 2048 }
  0x35   :  { %s53_s7 = sshll.u32 %s666_s6, 4  ;;  %p610_p10 = scmp.ne.s32.totalorder %s797_s3, %s609_s11  ;;  %s54_s7 = int_to_ptr.vmem [resolvable:$true] %s53_s7 }
  0x36   :  { %p613_p11 = scmp.lt.u32.totalorder %s609_s11, %s797_s3 }
  0x38   :  { %p615_p12 = pnand %p613_p11, %p610_p10 }
  0x3a   :  { %618 = shalt.err (!%p615_p12)
}
  0x3b   :  { %s619_s16 = scalar_lea.vmem %s54_s7, 2048  ;;  %p624_p0 = scmp.lt.s32.totalorder %s54_s7, %s54_s7 }
  0x3c   :  { %p620_p13 = scmp.ne.s32.totalorder %s54_s7, %s619_s16  ;;  %p625_p1 = scmp.lt.s32.totalorder %s619_s16, %s619_s16 }
  0x3e   :  { %p626_p2 = por %p625_p1, %p624_p0 }
  0x40   :  { %p627_p3 = pnand %p626_p2, %p620_p13 }
  0x42   :  { %630 = shalt.err (!%p627_p3)
}
  0x43   :  { %59 = dma.hbm_to_vmem [thread:$0]  %s797_s3, 2048, %s54_s7, [#allocation9], %s662_s28, %s662_s28, %s663_s29  }
  0x44   :  { %653 = dma.done.wait [#allocation3], 128  }
  0x45   :  { %654 = vsyncadd [#allocation3], 4294967168 }
  0x46   :  { %655 = dma.done.wait [#allocation6], 2560  }
  0x47   :  { %656 = vsyncadd [#allocation6], 4294964736 }
  0x48   :  { %657 = dma.done.wait [#allocation9], 2048  }
  0x49   :  { %658 = vsyncadd [#allocation9], 4294965248  ;;  %v667_v0 = vmov 0.0|0.0   ;;  %vm668_vm0 = vmmov 0   ;;  %v669_v1 = vmov 0.0   ;;  %v76_v2 = vld [vmem:[#allocation5] sm:$0xff]  ;;  %v80_v54 = vlaneseq }
  0x4a   :  { %479 = vmatprep.subr.bf16.mxu0 %v667_v0  ;;  %406 = vmatprep.mubr.msk.f32.mxu0 %vm668_vm0, %v669_v1  ;;  %v77_v3 = vld [vmem:[#allocation5 + $0x8] sm:$0xff]  ;;  %v78_v4 = vld [vmem:[#allocation5 + $0x10] sm:$0xff]  ;;  %v79_v6 = vld [vmem:[#allocation5 + $0x18] sm:$0xff]  ;;  %vm84_vm1 = vcmask 261120  }
  0x4b   :  { %485 = vmatprep.subr.bf16.mxu1 %v667_v0  ;;  %441 = vmatprep.mubr.msk.f32.mxu1 %vm668_vm0, %v669_v1  ;;  %v480_v5 = vpack.c.bf16 %v77_v3, %v76_v2  ;;  %v159_v7 = vld [vmem:[#allocation7] sm:$0xff]  ;;  %v160_v8 = vld [vmem:[#allocation7 + $0x8] sm:$0xff]  ;;  %v161_v9 = vld [vmem:[#allocation7 + $0x10] sm:$0xff]  ;;  %v483_v11 = vpack.c.bf16 %v79_v6, %v78_v4  ;;  %v81_v55 = vshrl.u32 %v80_v54, 7 }
  0x4c   :  { %v162_v10 = vld [vmem:[#allocation7 + $0x18] sm:$0xff]  ;;  %v486_v12 = vpack.c.bf16 %v160_v8, %v159_v7  ;;  %v163_v14 = vld [vmem:[#allocation7 + $0x20] sm:$0xff]  ;;  %v164_v15 = vld [vmem:[#allocation7 + $0x28] sm:$0xff] }
  0x4d   :  { %481 = vmatpush3.bf16.msra.mxu0 %v480_v5  ;;  %v489_v13 = vpack.c.bf16 %v162_v10, %v161_v9  ;;  %v75_v16 = vld [vmem:[#allocation2] sm:$0xff]  ;;  %v492_v17 = vpack.c.bf16 %v164_v15, %v163_v14  ;;  %v165_v18 = vld [vmem:[#allocation7 + $0x30] sm:$0xff]  ;;  %v167_v21 = vld [vmem:[#allocation7 + $0x40] sm:$0xff]  ;;  %v82_v56 = vsub.s32 0, %v81_v55  ;;  %v177_v3 = vsub.s32 1, %v81_v55 }
  0x4e   :  { %482 = vmatprep.subr.bf16.mxu0 %v667_v0  ;;  %487 = vmatpush3.bf16.msra.mxu1 %v486_v12  ;;  %v166_v19 = vld [vmem:[#allocation7 + $0x38] sm:$0xff]  ;;  %v168_v22 = vld [vmem:[#allocation7 + $0x48] sm:$0xff]  ;;  %v169_v24 = vld [vmem:[#allocation7 + $0x50] sm:$0xff]  ;;  %v268_v8 = vsub.s32 2, %v81_v55 }
  0x4f   :  { %488 = vmatprep.subr.bf16.mxu1 %v667_v0  ;;  %v495_v20 = vpack.c.bf16 %v166_v19, %v165_v18  ;;  %v498_v23 = vpack.c.bf16 %v168_v22, %v167_v21  ;;  %v170_v25 = vld [vmem:[#allocation7 + $0x58] sm:$0xff]  ;;  %v171_v27 = vld [vmem:[#allocation7 + $0x60] sm:$0xff]  ;;  %v172_v28 = vld [vmem:[#allocation7 + $0x68] sm:$0xff] }
  0x50   :  { %v501_v26 = vpack.c.bf16 %v170_v25, %v169_v24  ;;  %v504_v29 = vpack.c.bf16 %v172_v28, %v171_v27  ;;  %v173_v30 = vld [vmem:[#allocation7 + $0x70] sm:$0xff]  ;;  %v174_v31 = vld [vmem:[#allocation7 + $0x78] sm:$0xff]  ;;  %v250_v33 = vld [vmem:[#allocation8] sm:$0xff] }
  0x51   :  { %484 = vmatpush3.bf16.msra.mxu0 %v483_v11  ;;  %v507_v32 = vpack.c.bf16 %v174_v31, %v173_v30  ;;  %v251_v34 = vld [vmem:[#allocation8 + $0x8] sm:$0xff]  ;;  %v252_v35 = vld [vmem:[#allocation8 + $0x10] sm:$0xff]  ;;  %v253_v37 = vld [vmem:[#allocation8 + $0x18] sm:$0xff] }
  0x52   :  { %509 = vmatprep.subr.bf16.mxu0 %v667_v0  ;;  %490 = vmatpush3.bf16.msra.mxu1 %v489_v13  ;;  %v510_v36 = vpack.c.bf16 %v251_v34, %v250_v33  ;;  %v513_v38 = vpack.c.bf16 %v253_v37, %v252_v35  ;;  %v254_v39 = vld [vmem:[#allocation8 + $0x20] sm:$0xff]  ;;  %v255_v40 = vld [vmem:[#allocation8 + $0x28] sm:$0xff]  ;;  %v256_v42 = vld [vmem:[#allocation8 + $0x30] sm:$0xff] }
  0x53   :  { %491 = vmatprep.subr.bf16.mxu1 %v667_v0  ;;  %v516_v41 = vpack.c.bf16 %v255_v40, %v254_v39  ;;  %v257_v43 = vld [vmem:[#allocation8 + $0x38] sm:$0xff]  ;;  %v258_v45 = vld [vmem:[#allocation8 + $0x40] sm:$0xff]  ;;  %v259_v46 = vld [vmem:[#allocation8 + $0x48] sm:$0xff] }
  0x54   :  { %407 = vmatmul.mubr.msk.f32.vlgmr.msra.gmra.mrb[0].mxu0 %vm84_vm1, %v75_v16  ;;  %v519_v44 = vpack.c.bf16 %v257_v43, %v256_v42  ;;  %v522_v47 = vpack.c.bf16 %v259_v46, %v258_v45  ;;  %v260_v48 = vld [vmem:[#allocation8 + $0x50] sm:$0xff]  ;;  %v261_v49 = vld [vmem:[#allocation8 + $0x58] sm:$0xff]  ;;  %v262_v51 = vld [vmem:[#allocation8 + $0x60] sm:$0xff] }
  0x55   :  { %476 = vmatprep.mubr.msk.f32.mxu0 %vm668_vm0, %v669_v1  ;;  %511 = vmatpush3.bf16.msra.mxu0 %v510_v36  ;;  %v525_v50 = vpack.c.bf16 %v261_v49, %v260_v48  ;;  %v263_v52 = vld [vmem:[#allocation8 + $0x68] sm:$0xff]  ;;  %v74_v57 = vld [vmem:[%s798_s4] sm:$0x7]  ;;  %v264_v63 = vld [vmem:[#allocation8 + $0x70] sm:$0xff]  ;;  %s670_s4 = smov [#allocation10]  }
  0x56   :  { %493 = vmatpush3.bf16.msra.mxu1 %v492_v17  ;;  %512 = vmatprep.subr.bf16.mxu0 %v667_v0  ;;  %v528_v53 = vpack.c.bf16 %v263_v52, %v262_v51  ;;  %v83_v58 = vrot.slane %v74_v57, %v82_v56  ;;  %v265_v1 = vld [vmem:[#allocation8 + $0x78] sm:$0xff]  ;;  %v178_v4 = vrot.slane %v74_v57, %v177_v3  ;;  %s347_s29 = sshll.u32 %s670_s4, 4  ;;  %s348_s29 = int_to_ptr.vmem [resolvable:$true] %s347_s29 }
  0x57   :  { %494 = vmatprep.subr.bf16.mxu1 %v667_v0  ;;  %v531_v2 = vpack.c.bf16 %v265_v1, %v264_v63  ;;  %v269_v9 = vrot.slane %v74_v57, %v268_v8  ;;  %s631_s17 = scalar_lea.vmem %s348_s29, 128  ;;  %p636_p5 = scmp.lt.s32.totalorder %s348_s29, %s348_s29 }
  0x58   :  { %p632_p4 = scmp.ne.s32.totalorder %s348_s29, %s631_s17  ;;  %p637_p6 = scmp.lt.s32.totalorder %s631_s17, %s631_s17 }
  0x59   :  { %514 = vmatpush3.bf16.msra.mxu0 %v513_v38 }
  0x5a   :  { %496 = vmatpush3.bf16.msra.mxu1 %v495_v20  ;;  %515 = vmatprep.subr.bf16.mxu0 %v667_v0  ;;  %p638_p7 = por %p637_p6, %p636_p5 }
  0x5b   :  { %497 = vmatprep.subr.bf16.mxu1 %v667_v0 }
  0x5c   :  { %p639_p8 = pnand %p638_p7, %p632_p4 }
  0x5d   :  { %517 = vmatpush3.bf16.msra.mxu0 %v516_v41 }
  0x5e   :  { %499 = vmatpush3.bf16.msra.mxu1 %v498_v23  ;;  %518 = vmatprep.subr.bf16.mxu0 %v667_v0 }
  0x5f   :  { %500 = vmatprep.subr.bf16.mxu1 %v667_v0 }
  0x61   :  { %520 = vmatpush3.bf16.msra.mxu0 %v519_v44 }
  0x62   :  { %502 = vmatpush3.bf16.msra.mxu1 %v501_v26  ;;  %521 = vmatprep.subr.bf16.mxu0 %v667_v0 }
  0x63   :  { %503 = vmatprep.subr.bf16.mxu1 %v667_v0 }
  0x65   :  { %523 = vmatpush3.bf16.msra.mxu0 %v522_v47 }
  0x66   :  { %505 = vmatpush3.bf16.msra.mxu1 %v504_v29  ;;  %524 = vmatprep.subr.bf16.mxu0 %v667_v0 }
  0x67   :  { %506 = vmatprep.subr.bf16.mxu1 %v667_v0 }
  0x69   :  { %526 = vmatpush3.bf16.msra.mxu0 %v525_v50 }
  0x6a   :  { %508 = vmatpush3.bf16.msra.mxu1 %v507_v32  ;;  %527 = vmatprep.subr.bf16.mxu0 %v667_v0 }
  0x6d   :  { %529 = vmatpush3.bf16.msra.mxu0 %v528_v53 }
  0x6e   :  { %530 = vmatprep.subr.bf16.mxu0 %v667_v0 }
  0x71   :  { %532 = vmatpush3.bf16.msra.mxu0 %v531_v2 }
 0x127   :  { %v154_v59 = vpop.f32.mrb[0].mxu0 }
 0x128   :  { %v155_v60 = vadd.f32 %v154_v59, %v83_v58  ;;  %v408_v61 = vpop.f32.mrb[1].mxu0 }
 0x12a   :  { %v158_v62 = vmax.f32 %v155_v60, 0.0 }
 0x12c   :  { %442 = vmatmul.mubr.f32.vlgmr.msra.gmra.mrb[0].mxu1 %v158_v62 }
 0x1ff   :  { %v245_v0 = vpop.f32.mrb[0].mxu1 }
 0x200   :  { %v246_v5 = vadd.f32 %v245_v0, %v178_v4  ;;  %v443_v6 = vpop.f32.mrb[1].mxu1 }
 0x202   :  { %v249_v7 = vmax.f32 %v246_v5, 0.0 }
 0x204   :  { %477 = vmatmul.mubr.f32.vlgmr.msra.gmra.mrb[2].mxu0 %v249_v7 }
 0x2d7   :  { %v336_v10 = vpop.f32.mrb[2].mxu0 }
 0x2d8   :  { %v337_v11 = vadd.f32 %v336_v10, %v269_v9  ;;  %v478_v12 = vpop.f32.mrb[3].mxu0 }
 0x2da   :  { %340 = vst [vmem:[#allocation10] sm:$0xff] %v337_v11 }
 0x2db   :  { %642 = shalt.err (!%p639_p8)
}
 0x2dc   :  { %s643_s19 = scalar_lea.hbm %s799_s5, 128 }
 0x2dd   :  { %p644_p9 = scmp.ne.s32.totalorder %s799_s5, %s643_s19  ;;  %p647_p10 = scmp.lt.u32.totalorder %s643_s19, %s799_s5 }
 0x2df   :  { %p649_p11 = pnand %p647_p10, %p644_p9 }
 0x2e1   :  { %652 = shalt.err (!%p649_p11)
}
 0x2e2   :  { %350 = dma.vmem_to_hbm [thread:$0]  %s348_s29, 128, %s799_s5, [#allocation4]  }
 0x2e3   :  { %659 = dma.done.wait [#allocation4], 128  }
 0x2e4   :  { %660 = vsyncadd [#allocation4], 4294967168 }
 0x2e5   :  { %354 = vsyncpa [#allocation3], 1 }
 0x2e6   :  { %355 = vsyncpa [#allocation6], 1 }
 0x2e7   :  { %356 = vsyncpa [#allocation9], 1 }
 0x2e8   :  { %357 = vsyncpa [#allocation4], 1 }

</bundles_post_ra>
